<compile_context>
chip_gen: v7x
topology: tpu7x:2x2x1
jax: 0.10.0
libtpu: 0.0.40
codegen_flags: <defaults>
</compile_context>

<pallas_src>
import jax
import jax.numpy as jnp
from jax.experimental import pallas as pl
from jax.experimental.pallas import tpu as pltpu


def _round_up(x, n):
    return ((x + n - 1) // n) * n


def irm_kernel(x_ref, m_ref, ws_ref, wabs_ref, bias_ref, o_ref):
    x = x_ref[...].astype(jnp.float32)                 # (tm, in_dim)
    mask = (m_ref[...] != 0).astype(jnp.float32)       # (tm, in_dim), int8 in HBM
    xm = x * mask

    # numerator: sum_i (scale[o]*W[i,o]) * mask * x   -> MXU matmul (scale pre-folded)
    num = jnp.dot(xm, ws_ref[...], preferred_element_type=jnp.float32)       # (tm, out_dim)
    # denominator: sum_i |W[i,o]| * mask + 1e-5       -> MXU matmul (|W| precomputed)
    den = jnp.dot(mask, wabs_ref[...], preferred_element_type=jnp.float32) + 1e-5

    out = num * pl.reciprocal(den, approx=False) + bias_ref[...]
    o_ref[...] = out.astype(o_ref.dtype)


def irm_forward(x, m, weight, scale, bias, *, tm=512):
    """x, m: (batch, dim, in_dim); weight: (in_dim, out_dim); scale, bias: (out_dim,)."""
    batch, dim, in_dim = x.shape
    out_dim = weight.shape[-1]
    M = batch * dim

    # One-time wrapper-side prep: fold scale into W, precompute |W|.
    w_scaled = weight.astype(jnp.float32) * scale.reshape(1, out_dim).astype(jnp.float32)
    w_abs = jnp.abs(weight).astype(jnp.float32)
    bias2 = bias.reshape(1, out_dim).astype(jnp.float32)

    # Flatten rows; mask goes to int8 (memory-bound kernel, 4x fewer bytes).
    x2 = x.reshape(M, in_dim)
    m2 = (m.reshape(M, in_dim) != 0).astype(jnp.int8)

    # Real row tiling with tail padding.  Padded rows have an all-zero mask so
    # their output is just `bias`; they are sliced off below.
    tm = min(tm, _round_up(M, 8))
    M_pad = _round_up(M, tm)
    if M_pad != M:
        x2 = jnp.pad(x2, ((0, M_pad - M), (0, 0)))
        m2 = jnp.pad(m2, ((0, M_pad - M), (0, 0)))
    grid = (M_pad // tm,)

    itemsize = jnp.dtype(x.dtype).itemsize
    # Advisory cost estimate for XLA scheduling around the custom call.
    cost = pl.CostEstimate(
        flops=4 * M_pad * in_dim * out_dim,
        transcendentals=M_pad * out_dim,
        bytes_accessed=(M_pad * in_dim * itemsize          # x
                        + M_pad * in_dim * 1               # int8 mask
                        + 2 * in_dim * out_dim * 4         # W', |W|
                        + out_dim * 4                      # bias
                        + M_pad * out_dim * itemsize),     # out
    )

    # Per-step VMEM footprint (double-buffered inputs/outputs + resident weights),
    # with headroom; kept <= 64 MiB so it is valid on v7x as well.
    per_step = (2 * (tm * in_dim * itemsize + tm * in_dim * 1 + tm * out_dim * itemsize)
                + 2 * (2 * in_dim * out_dim * 4 + out_dim * 4))
    vmem_limit = int(min(max(4 * per_step, 16 * 1024 * 1024), 64 * 1024 * 1024))

    out2 = pl.pallas_call(
        irm_kernel,
        out_shape=jax.ShapeDtypeStruct((M_pad, out_dim), x.dtype),
        grid_spec=pltpu.PrefetchScalarGridSpec(
            num_scalar_prefetch=0,
            grid=grid,
            in_specs=[
                pl.BlockSpec((tm, in_dim), lambda i: (i, 0)),       # x rows
                pl.BlockSpec((tm, in_dim), lambda i: (i, 0)),       # int8 mask rows
                pl.BlockSpec((in_dim, out_dim), lambda i: (0, 0)),  # scale-folded W
                pl.BlockSpec((in_dim, out_dim), lambda i: (0, 0)),  # |W|
                pl.BlockSpec((1, out_dim), lambda i: (0, 0)),       # bias
            ],
            out_specs=pl.BlockSpec((tm, out_dim), lambda i: (i, 0)),
        ),
        compiler_params=pltpu.CompilerParams(
            dimension_semantics=("parallel",),
            vmem_limit_bytes=vmem_limit,
        ),
        cost_estimate=cost,
    )(x2, m2, w_scaled, w_abs, bias2)

    return out2[:M].reshape(batch, dim, out_dim)


def irm_reference(x, m, weight, scale, bias):
    """Pure-JAX reference matching the PyTorch forward exactly."""
    batch, dim, in_dim = x.shape
    out_dim = weight.shape[-1]
    w = jnp.broadcast_to(weight[None, None], (batch, dim, in_dim, out_dim))
    w = jnp.where((m != 0)[..., None], w, 0.0)
    w = w / (jnp.sum(jnp.abs(w), axis=-2, keepdims=True) + 1e-5)
    out = jnp.sum(w * x[..., None], axis=2)
    return scale.reshape(1, 1, out_dim) * out + bias.reshape(1, 1, out_dim)


if __name__ == "__main__":
    key = jax.random.PRNGKey(0)
    batch, dim, in_dim, out_dim = 2, 4, 16, 32

    kx, km, kw, ks = jax.random.split(key, 4)
    x = jax.random.normal(kx, (batch, dim, in_dim), dtype=jnp.float32)
    # binary mask, ~70% kept
    m = (jax.random.uniform(km, (batch, dim, in_dim)) > 0.3).astype(jnp.float32)

    # Parameters: init matches the module (ones / zeros / ones), then perturbed
    # so the scale-fold / |W| precompute paths are actually exercised.
    weight = jnp.ones((in_dim, out_dim), dtype=jnp.float32) + 0.1 * jax.random.normal(
        kw, (in_dim, out_dim), dtype=jnp.float32)
    bias = jnp.zeros((out_dim,), dtype=jnp.float32) + 0.05
    scale = jnp.ones((out_dim,), dtype=jnp.float32) + 0.1 * jax.random.normal(
        ks, (out_dim,), dtype=jnp.float32)

    out = irm_forward(x, m, weight, scale, bias)
    jax.block_until_ready(out)

    ref = irm_reference(x, m, weight, scale, bias)
    assert out.shape == (batch, dim, out_dim)
    assert jnp.allclose(out, ref, atol=1e-5, rtol=1e-5), "mismatch vs reference"

    print("KERNEL_OK")
</pallas_src>

<mosaic_0001>
module attributes {stable_mosaic.version = 11 : i64} {
  func.func @irm_kernel(%arg0: i32, %arg1: memref<8x16xf32, #tpu.memory_space<vmem>>, %arg2: memref<8x16xi8, #tpu.memory_space<vmem>>, %arg3: memref<16x32xf32, #tpu.memory_space<vmem>>, %arg4: memref<16x32xf32, #tpu.memory_space<vmem>>, %arg5: memref<1x32xf32, #tpu.memory_space<vmem>>, %arg6: memref<8x32xf32, #tpu.memory_space<vmem>>) attributes {dimension_semantics = [#tpu.dimension_semantics<parallel>], iteration_bounds = array<i64: 1>, scalar_prefetch = 0 : i64, scratch_operands = 0 : i64, tpu.core_type = #tpu.core_type<tc>, window_params = [{transform_indices = @transform_0, window_bounds = array<i64: 8, 16>}, {transform_indices = @transform_1, window_bounds = array<i64: 8, 16>}, {pipeline_mode = #tpu.pipeline_mode<synchronous>, transform_indices = @transform_2, window_bounds = array<i64: 16, 32>}, {pipeline_mode = #tpu.pipeline_mode<synchronous>, transform_indices = @transform_3, window_bounds = array<i64: 16, 32>}, {pipeline_mode = #tpu.pipeline_mode<synchronous>, transform_indices = @transform_4, window_bounds = array<i64: 1, 32>}, {transform_indices = @transform_5, window_bounds = array<i64: 8, 32>}]} {
    %c0 = arith.constant 0 : index
    %c0_0 = arith.constant 0 : index
    %0 = vector.load %arg1[%c0, %c0_0] : memref<8x16xf32, #tpu.memory_space<vmem>>, vector<8x16xf32>
    %c0_1 = arith.constant 0 : index
    %c0_2 = arith.constant 0 : index
    %1 = vector.load %arg2[%c0_1, %c0_2] : memref<8x16xi8, #tpu.memory_space<vmem>>, vector<8x16xi8>
    %c0_i8 = arith.constant 0 : i8
    %2 = vector.broadcast %c0_i8 : i8 to vector<8x16xi8>
    %3 = arith.cmpi ne, %1, %2 : vector<8x16xi8>
    %4 = arith.extui %3 : vector<8x16xi1> to vector<8x16xi32>
    %5 = arith.sitofp %4 : vector<8x16xi32> to vector<8x16xf32>
    %6 = arith.mulf %0, %5 : vector<8x16xf32>
    %c0_3 = arith.constant 0 : index
    %c0_4 = arith.constant 0 : index
    %7 = vector.load %arg3[%c0_3, %c0_4] : memref<16x32xf32, #tpu.memory_space<vmem>>, vector<16x32xf32>
    %cst = arith.constant dense<0.000000e+00> : vector<8x32xf32>
    %8 = tpu.matmul %6, %7, %cst {dimension_numbers = #tpu.dot_dimension_numbers<[1], [0], [0], [1], [0, 0, 1, 1], [], []>} : vector<8x16xf32>, vector<16x32xf32>, vector<8x32xf32> -> vector<8x32xf32>
    %c0_5 = arith.constant 0 : index
    %c0_6 = arith.constant 0 : index
    %9 = vector.load %arg4[%c0_5, %c0_6] : memref<16x32xf32, #tpu.memory_space<vmem>>, vector<16x32xf32>
    %cst_7 = arith.constant dense<0.000000e+00> : vector<8x32xf32>
    %10 = tpu.matmul %5, %9, %cst_7 {dimension_numbers = #tpu.dot_dimension_numbers<[1], [0], [0], [1], [0, 0, 1, 1], [], []>} : vector<8x16xf32>, vector<16x32xf32>, vector<8x32xf32> -> vector<8x32xf32>
    %cst_8 = arith.constant 9.99999974E-6 : f32
    %11 = vector.broadcast %cst_8 : f32 to vector<8x32xf32>
    %12 = arith.addf %10, %11 : vector<8x32xf32>
    %13 = tpu.reciprocal %12 : vector<8x32xf32> -> vector<8x32xf32>
    %14 = arith.mulf %8, %13 : vector<8x32xf32>
    %c0_9 = arith.constant 0 : index
    %c0_10 = arith.constant 0 : index
    %15 = vector.load %arg5[%c0_9, %c0_10] : memref<1x32xf32, #tpu.memory_space<vmem>>, vector<1x32xf32>
    %16 = vector.broadcast %15 : vector<1x32xf32> to vector<8x32xf32>
    %17 = arith.addf %14, %16 : vector<8x32xf32>
    %c0_11 = arith.constant 0 : index
    %c0_12 = arith.constant 0 : index
    %18 = vector.load %arg6[%c0_11, %c0_12] : memref<8x32xf32, #tpu.memory_space<vmem>>, vector<8x32xf32>
    tpu.vector_store %arg6[%c0_11, %c0_12], %17 {strides = array<i32>} : memref<8x32xf32, #tpu.memory_space<vmem>>, vector<8x32xf32>,
    return
  }
  func.func @transform_0(%arg0: i32) -> (i32, i32) {
    %c0_i32 = arith.constant 0 : i32
    %c0_i32_0 = arith.constant 0 : i32
    return %arg0, %c0_i32 : i32, i32
  }
  func.func @transform_1(%arg0: i32) -> (i32, i32) {
    %c0_i32 = arith.constant 0 : i32
    %c0_i32_0 = arith.constant 0 : i32
    return %arg0, %c0_i32 : i32, i32
  }
  func.func @transform_2(%arg0: i32) -> (i32, i32) {
    %c0_i32 = arith.constant 0 : i32
    %c0_i32_0 = arith.constant 0 : i32
    %c0_i32_1 = arith.constant 0 : i32
    return %c0_i32, %c0_i32_0 : i32, i32
  }
  func.func @transform_3(%arg0: i32) -> (i32, i32) {
    %c0_i32 = arith.constant 0 : i32
    %c0_i32_0 = arith.constant 0 : i32
    %c0_i32_1 = arith.constant 0 : i32
    return %c0_i32, %c0_i32_0 : i32, i32
  }
  func.func @transform_4(%arg0: i32) -> (i32, i32) {
    %c0_i32 = arith.constant 0 : i32
    %c0_i32_0 = arith.constant 0 : i32
    %c0_i32_1 = arith.constant 0 : i32
    return %c0_i32, %c0_i32_0 : i32, i32
  }
  func.func @transform_5(%arg0: i32) -> (i32, i32) {
    %c0_i32 = arith.constant 0 : i32
    %c0_i32_0 = arith.constant 0 : i32
    return %arg0, %c0_i32 : i32, i32
  }
}

</mosaic_0001>

<bundles_post_ra>
// kernel: tpu_custom_call.1
= control target key start
LH: loop header
LB: loop body
LE: loop exit
PB: predicated region body
PF: predicated region fallthrough
CT: control target
= control target key end

     0   :  { %10 = vsyncpa [#allocation3], 0  ;;  %s486_s0 = inlined_call_operand.hbm [shape: f32[8,16], index: 0, kind: input, shape index: {}]   ;;  %s487_s1 = inlined_call_operand.vmem [shape: s8[8,16], index: 1, kind: input, shape index: {}]   ;;  %s488_s2 = inlined_call_operand.hbm [shape: f32[16,32], index: 2, kind: input, shape index: {}]   ;;  %s489_s3 = inlined_call_operand.hbm [shape: f32[16,32], index: 3, kind: input, shape index: {}]   ;;  %s490_s4 = inlined_call_operand.vmem [shape: f32[1,32], index: 4, kind: input, shape index: {}]   ;;  %s491_s5 = inlined_call_operand.hbm [shape: f32[8,32], index: 5, kind: output, shape index: {}]  }
   0x1   :  { %11 = vsyncpa [#allocation6], 0 }
   0x2   :  { %12 = vsyncpa [#allocation4], 0  ;;  %s386_s18 = smov [#allocation5]   ;;  %s292_s22 = scalar_lea.hbm %s488_s2, 256 }
   0x3   :  { %s30_s19 = sshll.u32 %s386_s18, 4  ;;  %p293_p0 = scmp.ne.s32.totalorder %s488_s2, %s292_s22  ;;  %s31_s19 = int_to_ptr.vmem [resolvable:$true] %s30_s19 }
   0x4   :  { %p296_p1 = scmp.lt.u32.totalorder %s292_s22, %s488_s2 }
   0x6   :  { %p298_p2 = pnand %p296_p1, %p293_p0 }
   0x8   :  { %301 = shalt.err (!%p298_p2)
}
   0x9   :  { %s302_s27 = scalar_lea.vmem %s31_s19, 256  ;;  %p307_p4 = scmp.lt.s32.totalorder %s31_s19, %s31_s19 }
   0xa   :  { %p303_p3 = scmp.ne.s32.totalorder %s31_s19, %s302_s27  ;;  %p308_p5 = scmp.lt.s32.totalorder %s302_s27, %s302_s27 }
   0xc   :  { %p309_p6 = por %p308_p5, %p307_p4 }
   0xe   :  { %p310_p7 = pnand %p309_p6, %p303_p3 }
  0x10   :  { %313 = shalt.err (!%p310_p7)
}
  0x11   :  { %s387_s28 = smov 128   ;;  %s388_s29 = smov 8  }
  0x12   :  { %36 = dma.hbm_to_vmem [thread:$0]  %s488_s2, 256, %s31_s19, [#allocation6], %s387_s28, %s387_s28, %s388_s29  }
  0x13   :  { %s389_s7 = smov [#allocation2]   ;;  %s390_s9 = smov [#allocation7]  }
  0x14   :  { %s19_s8 = sshll.u32 %s389_s7, 4  ;;  %s42_s10 = sshll.u32 %s390_s9, 4  ;;  %s20_s8 = int_to_ptr.vmem [resolvable:$true] %s19_s8  ;;  %s43_s10 = int_to_ptr.vmem [resolvable:$true] %s42_s10 }
  0x15   :  { %s314_s13 = scalar_lea.hbm %s486_s0, 128 }
  0x16   :  { %p315_p8 = scmp.ne.s32.totalorder %s486_s0, %s314_s13  ;;  %p318_p9 = scmp.lt.u32.totalorder %s314_s13, %s486_s0 }
  0x18   :  { %p320_p10 = pnand %p318_p9, %p315_p8 }
  0x1a   :  { %323 = shalt.err (!%p320_p10)
}
  0x1b   :  { %s324_s2 = scalar_lea.vmem %s20_s8, 128  ;;  %p329_p12 = scmp.lt.s32.totalorder %s20_s8, %s20_s8 }
  0x1c   :  { %p325_p11 = scmp.ne.s32.totalorder %s20_s8, %s324_s2  ;;  %p330_p13 = scmp.lt.s32.totalorder %s324_s2, %s324_s2 }
  0x1e   :  { %p331_p0 = por %p330_p13, %p329_p12 }
  0x20   :  { %p332_p1 = pnand %p331_p0, %p325_p11 }
  0x22   :  { %335 = shalt.err (!%p332_p1)
}
  0x23   :  { %22 = dma.hbm_to_vmem [thread:$0]  %s486_s0, 128, %s20_s8, [#allocation3]  }
  0x24   :  { %s336_s22 = scalar_lea.hbm %s489_s3, 256 }
  0x25   :  { %p337_p2 = scmp.ne.s32.totalorder %s489_s3, %s336_s22  ;;  %p340_p3 = scmp.lt.u32.totalorder %s336_s22, %s489_s3 }
  0x27   :  { %p342_p4 = pnand %p340_p3, %p337_p2 }
  0x29   :  { %345 = shalt.err (!%p342_p4)
}
  0x2a   :  { %s346_s27 = scalar_lea.vmem %s43_s10, 256  ;;  %p351_p6 = scmp.lt.s32.totalorder %s43_s10, %s43_s10 }
  0x2b   :  { %p347_p5 = scmp.ne.s32.totalorder %s43_s10, %s346_s27  ;;  %p352_p7 = scmp.lt.s32.totalorder %s346_s27, %s346_s27 }
  0x2d   :  { %p353_p8 = por %p352_p7, %p351_p6 }
  0x2f   :  { %p354_p9 = pnand %p353_p8, %p347_p5 }
  0x31   :  { %357 = shalt.err (!%p354_p9)
}
  0x32   :  { %48 = dma.hbm_to_vmem [thread:$0]  %s489_s3, 256, %s43_s10, [#allocation6], %s387_s28, %s387_s28, %s388_s29  }
  0x33   :  { %380 = dma.done.wait [#allocation3], 128  }
  0x34   :  { %381 = vsyncadd [#allocation3], 4294967168 }
  0x35   :  { %382 = dma.done.wait [#allocation6], 512  }
  0x36   :  { %383 = vsyncadd [#allocation6], 4294966784  ;;  %v391_v0 = vmov 0.0|0.0   ;;  %vm392_vm0 = vmmov 0   ;;  %v393_v1 = vmov 0.0   ;;  %v147_v2 = vld [vmem:[#allocation7] sm:$0xff] }
  0x37   :  { %277 = vmatprep.subr.bf16.mxu1 %v391_v0  ;;  %271 = vmatprep.mubr.msk.f32.mxu1 %vm392_vm0, %v393_v1  ;;  %v148_v3 = vld [vmem:[#allocation7 + $0x8] sm:$0xff]  ;;  %v71_v6 = vld [vmem:[#allocation5] sm:$0xff]  ;;  %v72_v7 = vld [vmem:[#allocation5 + $0x8] sm:$0xff]  ;;  %v394_v9 = vmov 0   ;;  %vm73_vm2 = vcmask 130048   ;;  %s395_s28 = smov [#allocation8]  }
  0x38   :  { %274 = vmatprep.subr.bf16.mxu0 %v391_v0  ;;  %264 = vmatprep.mubr.msk.f32.mxu0 %vm392_vm0, %v393_v1  ;;  %v278_v4 = vpack.c.bf16 %v148_v3, %v147_v2  ;;  %v63_v5 = vld [vmem:[%s487_s1] sm:$0x3]  ;;  %v275_v8 = vpack.c.bf16 %v72_v7, %v71_v6  ;;  %s240_s29 = sshll.u32 %s395_s28, 4  ;;  %vm232_vm4 = vcmask 261120   ;;  %s241_s29 = int_to_ptr.vmem [resolvable:$true] %s240_s29 }
  0x39   :  { %vm64_vm1 = vnez %v63_v5  ;;  %v62_v12 = vld [vmem:[#allocation2] sm:$0xff]  ;;  %s358_s8 = scalar_lea.vmem %s241_s29, 128  ;;  %p363_p11 = scmp.lt.s32.totalorder %s241_s29, %s241_s29 }
  0x3a   :  { %279 = vmatpush3.bf16.msra.mxu1 %v278_v4  ;;  %v65_v10 = vsel %vm64_vm1, 16843009, %v394_v9  ;;  %276 = vmatpush3.bf16.msra.mxu0 %v275_v8  ;;  %v253_v21 = vld [vmem:[%s490_s4] ss:$0 sm:$0xff]  ;;  %p359_p10 = scmp.ne.s32.totalorder %s241_s29, %s358_s8  ;;  %p364_p12 = scmp.lt.s32.totalorder %s358_s8, %s358_s8 }
  0x3b   :  { %v66_v11 = vunpack.c.0.s8 %v65_v10 }
  0x3c   :  { %p365_p13 = por %p364_p12, %p363_p11 }
  0x3d   :  { %vm67_vm3 = vcmp.ne.s32.totalorder %v66_v11, 0 }
  0x3e   :  { %v250_v13 = vsel %vm67_vm3, 1.0, %v393_v1  ;;  %p366_p0 = pnand %p365_p13, %p359_p10 }
  0x3f   :  { %v70_v14 = vmul.f32 %v250_v13, %v62_v12  ;;  %272 = vmatmul.mubr.msk.f32.vlgmr.msra.gmra.mrb[0].mxu1 %vm73_vm2, %v250_v13 }
  0x41   :  { %265 = vmatmul.mubr.msk.f32.vlgmr.msra.gmra.mrb[0].mxu0 %vm73_vm2, %v70_v14 }
 0x112   :  { %v218_v15 = vpop.f32.mrb[0].mxu1 }
 0x113   :  { %v219_v16 = vadd.f32 1e-05, %v218_v15  ;;  %v273_v17 = vpop.f32.mrb[1].mxu1 }
 0x114   :  { %v143_v18 = vpop.f32.mrb[0].mxu0 }
 0x115   :  { %290 = vrcp.f32 %v219_v16  ;;  %v266_v19 = vpop.f32.mrb[1].mxu0 }
 0x11f   :  { %v291_v20 = vpop.eup %290 }
 0x120   :  { %v223_v22 = vmul.f32 %v291_v20, %v143_v18 }
 0x122   :  { %v231_v23 = vadd.f32 %v253_v21, %v223_v22 }
 0x124   :  { %233 = vst.msk [vmem:[#allocation8] sm:$0xff] %vm232_vm4, %v231_v23 }
 0x125   :  { %369 = shalt.err (!%p366_p0)
}
 0x126   :  { %s370_s11 = scalar_lea.hbm %s491_s5, 128 }
 0x127   :  { %p371_p1 = scmp.ne.s32.totalorder %s491_s5, %s370_s11  ;;  %p374_p2 = scmp.lt.u32.totalorder %s370_s11, %s491_s5 }
 0x129   :  { %p376_p3 = pnand %p374_p2, %p371_p1 }
 0x12b   :  { %379 = shalt.err (!%p376_p3)
}
 0x12c   :  { %243 = dma.vmem_to_hbm [thread:$0]  %s241_s29, 128, %s491_s5, [#allocation4]  }
 0x12d   :  { %384 = dma.done.wait [#allocation4], 128  }
 0x12e   :  { %385 = vsyncadd [#allocation4], 4294967168 }
 0x12f   :  { %247 = vsyncpa [#allocation3], 1 }
 0x130   :  { %248 = vsyncpa [#allocation6], 1 }
 0x131   :  { %249 = vsyncpa [#allocation4], 1 }

</bundles_post_ra>
